<compile_context>
chip_gen: v6e
topology: v6e:2x2x1
jax: 0.10.0
libtpu: 0.0.40
codegen_flags: <defaults>
</compile_context>

<pallas_src>
import jax
import jax.numpy as jnp
from jax.experimental import pallas as pl
from jax.experimental.pallas import tpu as pltpu


K_PAD = 128        # first-layer K (65) zero-padded to a full lane width
MAX_TILE_B = 2048  # max rows per batch tile


def _round_up(a, m):
    return (a + m - 1) // m * m


def _choose_tiling(B):
    """Pick (tile_b, n_tiles) so tile_b <= MAX_TILE_B, tile_b % 8 == 0, and the
    grid count is even (>= 2) once the batch is big enough for v7x's 2 TCs."""
    n_tiles = max(1, -(-B // MAX_TILE_B))
    if B >= 1024:
        n_tiles = max(2, n_tiles)
        if n_tiles % 2:
            n_tiles += 1
    tile_b = _round_up(-(-B // n_tiles), 8)
    return tile_b, n_tiles


def mlp_kernel(x_ref,
               w1_ref, b1_ref,
               w2_ref, b2_ref,
               w3_ref, b3_ref,
               w4_ref, b4_ref,
               o_ref):
    # x tile arrives already in bf16 (cast + K-pad done in the wrapper).
    # All dots accumulate in f32 on the MXU; bias-add / ReLU run in f32.
    h = x_ref[...]

    h = jnp.dot(h, w1_ref[...], preferred_element_type=jnp.float32) + b1_ref[...]
    h = jnp.maximum(h, 0.0).astype(jnp.bfloat16)

    h = jnp.dot(h, w2_ref[...], preferred_element_type=jnp.float32) + b2_ref[...]
    h = jnp.maximum(h, 0.0).astype(jnp.bfloat16)

    h = jnp.dot(h, w3_ref[...], preferred_element_type=jnp.float32) + b3_ref[...]
    h = jnp.maximum(h, 0.0).astype(jnp.bfloat16)

    h = jnp.dot(h, w4_ref[...], preferred_element_type=jnp.float32) + b4_ref[...]
    h = jnp.maximum(h, 0.0)

    o_ref[...] = h.astype(o_ref.dtype)


def prepare_params(params):
    """One-time, outside the per-call jit: pad w1's K dim 65->128, cast weights
    to bf16 (MXU operands), keep biases in f32 (epilogue math stays f32)."""
    F = params["w1"].shape[0]
    w1 = jnp.zeros((K_PAD, params["w1"].shape[1]), jnp.bfloat16)
    w1 = w1.at[:F, :].set(params["w1"].astype(jnp.bfloat16))
    return {
        "w1": w1,
        "w2": params["w2"].astype(jnp.bfloat16),
        "w3": params["w3"].astype(jnp.bfloat16),
        "w4": params["w4"].astype(jnp.bfloat16),
        "b1": params["b1"].astype(jnp.float32),
        "b2": params["b2"].astype(jnp.float32),
        "b3": params["b3"].astype(jnp.float32),
        "b4": params["b4"].astype(jnp.float32),
        "in_features": F,
    }


@jax.jit
def mlp_forward(x, kparams):
    """x: (B, 65) float32. kparams: output of prepare_params()."""
    B, F = x.shape
    out_f = kparams["w4"].shape[1]  # 64

    tile_b, n_tiles = _choose_tiling(B)
    Bp = tile_b * n_tiles  # waste < 8 rows per tile

    # Pad batch to Bp rows, feature dim 65 -> 128 (lane-aligned K), cast x to
    # bf16 here so the kernel streams half the bytes for x.
    xp = jnp.zeros((Bp, K_PAD), jnp.bfloat16).at[:B, :F].set(
        x.astype(jnp.bfloat16))

    # Full-array blocks with a constant block index -> resident in VMEM
    # (Pallas skips the re-DMA when the block index doesn't change).
    def resident(a):
        return pl.BlockSpec(a.shape, lambda i: (0, 0))

    w1, b1 = kparams["w1"], kparams["b1"]
    w2, b2 = kparams["w2"], kparams["b2"]
    w3, b3 = kparams["w3"], kparams["b3"]
    w4, b4 = kparams["w4"], kparams["b4"]

    out = pl.pallas_call(
        mlp_kernel,
        out_shape=jax.ShapeDtypeStruct((Bp, out_f), x.dtype),
        grid=(n_tiles,),
        in_specs=[pl.BlockSpec((tile_b, K_PAD), lambda i: (i, 0)),
                  resident(w1), resident(b1),
                  resident(w2), resident(b2),
                  resident(w3), resident(b3),
                  resident(w4), resident(b4)],
        out_specs=pl.BlockSpec((tile_b, out_f), lambda i: (i, 0)),
        compiler_params=pltpu.CompilerParams(
            dimension_semantics=("parallel",),
            vmem_limit_bytes=32 * 1024 * 1024),
    )(xp, w1, b1, w2, b2, w3, b3, w4, b4)

    return out[:B]


def init_params(key):
    """Deterministic init mimicking torch.nn.Linear's U(-1/sqrt(in), 1/sqrt(in)).
    Weights stored transposed: (in_features, out_features)."""
    dims = [(65, 256), (256, 512), (512, 256), (256, 64)]
    params = {}
    for i, (fin, fout) in enumerate(dims, start=1):
        key, kw, kb = jax.random.split(key, 3)
        bound = 1.0 / jnp.sqrt(jnp.float32(fin))
        params[f"w{i}"] = jax.random.uniform(
            kw, (fin, fout), jnp.float32, minval=-bound, maxval=bound)
        params[f"b{i}"] = jax.random.uniform(
            kb, (1, fout), jnp.float32, minval=-bound, maxval=bound)
    return params


def reference_forward_f32(x, params):
    h = x
    for i in range(1, 5):
        h = jnp.maximum(h @ params[f"w{i}"] + params[f"b{i}"], 0.0)
    return h


def reference_forward_bf16(x, params):
    # Same math as the kernel: bf16 operands, f32 accumulation, f32 epilogue.
    h = x
    for i in range(1, 5):
        w = params[f"w{i}"].astype(jnp.bfloat16)
        h = jnp.maximum(
            jnp.dot(h.astype(jnp.bfloat16), w,
                    preferred_element_type=jnp.float32) + params[f"b{i}"],
            0.0)
    return h


if __name__ == "__main__":
    key = jax.random.PRNGKey(0)
    key, kx1, kx2, kx3 = jax.random.split(key, 4)
    params = init_params(key)
    kparams = prepare_params(params)   # one-time weight pad/cast, outside jit

    # Small primary test (single tile, tile_b = 8).
    B = 8
    x = jax.random.normal(kx1, (B, 65), jnp.float32)
    out = jax.block_until_ready(mlp_forward(x, kparams))
    assert out.shape == (B, 64)
    assert jnp.allclose(out, reference_forward_bf16(x, params),
                        atol=1e-2, rtol=1e-2), "mismatch vs bf16 reference"
    assert jnp.allclose(out, reference_forward_f32(x, params),
                        atol=5e-2, rtol=5e-2), "mismatch vs f32 reference"

    # B=520: previously padded to 1024 rows; now a single 520-row tile (0 waste).
    B2 = 520
    x2 = jax.random.normal(kx2, (B2, 65), jnp.float32)
    out2 = jax.block_until_ready(mlp_forward(x2, kparams))
    assert out2.shape == (B2, 64)
    assert jnp.allclose(out2, reference_forward_bf16(x2, params),
                        atol=1e-2, rtol=1e-2), "mismatch vs bf16 ref (B=520)"

    # B=1200: exercises grid=2 (even grid for v7x megacore) + 8-row granularity.
    B3 = 1200
    x3 = jax.random.normal(kx3, (B3, 65), jnp.float32)
    out3 = jax.block_until_ready(mlp_forward(x3, kparams))
    assert out3.shape == (B3, 64)
    assert jnp.allclose(out3, reference_forward_bf16(x3, params),
                        atol=1e-2, rtol=1e-2), "mismatch vs bf16 ref (B=1200)"

    print("KERNEL_OK")
</pallas_src>

<mosaic_0001>
module attributes {stable_mosaic.version = 11 : i64} {
  func.func @mlp_kernel(%arg0: i32, %arg1: memref<8x128xbf16, #tpu.memory_space<vmem>>, %arg2: memref<128x256xbf16, #tpu.memory_space<vmem>>, %arg3: memref<1x256xf32, #tpu.memory_space<vmem>>, %arg4: memref<256x512xbf16, #tpu.memory_space<vmem>>, %arg5: memref<1x512xf32, #tpu.memory_space<vmem>>, %arg6: memref<512x256xbf16, #tpu.memory_space<vmem>>, %arg7: memref<1x256xf32, #tpu.memory_space<vmem>>, %arg8: memref<256x64xbf16, #tpu.memory_space<vmem>>, %arg9: memref<1x64xf32, #tpu.memory_space<vmem>>, %arg10: memref<8x64xf32, #tpu.memory_space<vmem>>) attributes {dimension_semantics = [#tpu.dimension_semantics<parallel>], iteration_bounds = array<i64: 1>, scalar_prefetch = 0 : i64, scratch_operands = 0 : i64, tpu.core_type = #tpu.core_type<tc>, window_params = [{transform_indices = @transform_0, window_bounds = array<i64: 8, 128>}, {pipeline_mode = #tpu.pipeline_mode<synchronous>, transform_indices = @transform_1, window_bounds = array<i64: 128, 256>}, {pipeline_mode = #tpu.pipeline_mode<synchronous>, transform_indices = @transform_2, window_bounds = array<i64: 1, 256>}, {pipeline_mode = #tpu.pipeline_mode<synchronous>, transform_indices = @transform_3, window_bounds = array<i64: 256, 512>}, {pipeline_mode = #tpu.pipeline_mode<synchronous>, transform_indices = @transform_4, window_bounds = array<i64: 1, 512>}, {pipeline_mode = #tpu.pipeline_mode<synchronous>, transform_indices = @transform_5, window_bounds = array<i64: 512, 256>}, {pipeline_mode = #tpu.pipeline_mode<synchronous>, transform_indices = @transform_6, window_bounds = array<i64: 1, 256>}, {pipeline_mode = #tpu.pipeline_mode<synchronous>, transform_indices = @transform_7, window_bounds = array<i64: 256, 64>}, {pipeline_mode = #tpu.pipeline_mode<synchronous>, transform_indices = @transform_8, window_bounds = array<i64: 1, 64>}, {transform_indices = @transform_9, window_bounds = array<i64: 8, 64>}]} {
    %c0 = arith.constant 0 : index
    %c0_0 = arith.constant 0 : index
    %0 = vector.load %arg1[%c0, %c0_0] : memref<8x128xbf16, #tpu.memory_space<vmem>>, vector<8x128xbf16>
    %c0_1 = arith.constant 0 : index
    %c0_2 = arith.constant 0 : index
    %1 = vector.load %arg2[%c0_1, %c0_2] : memref<128x256xbf16, #tpu.memory_space<vmem>>, vector<128x256xbf16>
    %cst = arith.constant dense<0.000000e+00> : vector<8x256xf32>
    %2 = tpu.matmul %0, %1, %cst {dimension_numbers = #tpu.dot_dimension_numbers<[1], [0], [0], [1], [0, 0, 1, 1], [], []>} : vector<8x128xbf16>, vector<128x256xbf16>, vector<8x256xf32> -> vector<8x256xf32>
    %c0_3 = arith.constant 0 : index
    %c0_4 = arith.constant 0 : index
    %3 = vector.load %arg3[%c0_3, %c0_4] : memref<1x256xf32, #tpu.memory_space<vmem>>, vector<1x256xf32>
    %4 = vector.broadcast %3 : vector<1x256xf32> to vector<8x256xf32>
    %5 = arith.addf %2, %4 : vector<8x256xf32>
    %cst_5 = arith.constant 0.000000e+00 : f32
    %6 = vector.broadcast %cst_5 : f32 to vector<8x256xf32>
    %7 = arith.maximumf %5, %6 : vector<8x256xf32>
    %8 = arith.truncf %7 : vector<8x256xf32> to vector<8x256xbf16>
    %c0_6 = arith.constant 0 : index
    %c0_7 = arith.constant 0 : index
    %9 = vector.load %arg4[%c0_6, %c0_7] : memref<256x512xbf16, #tpu.memory_space<vmem>>, vector<256x512xbf16>
    %cst_8 = arith.constant dense<0.000000e+00> : vector<8x512xf32>
    %10 = tpu.matmul %8, %9, %cst_8 {dimension_numbers = #tpu.dot_dimension_numbers<[1], [0], [0], [1], [0, 0, 1, 1], [], []>} : vector<8x256xbf16>, vector<256x512xbf16>, vector<8x512xf32> -> vector<8x512xf32>
    %c0_9 = arith.constant 0 : index
    %c0_10 = arith.constant 0 : index
    %11 = vector.load %arg5[%c0_9, %c0_10] : memref<1x512xf32, #tpu.memory_space<vmem>>, vector<1x512xf32>
    %12 = vector.broadcast %11 : vector<1x512xf32> to vector<8x512xf32>
    %13 = arith.addf %10, %12 : vector<8x512xf32>
    %cst_11 = arith.constant 0.000000e+00 : f32
    %14 = vector.broadcast %cst_11 : f32 to vector<8x512xf32>
    %15 = arith.maximumf %13, %14 : vector<8x512xf32>
    %16 = arith.truncf %15 : vector<8x512xf32> to vector<8x512xbf16>
    %c0_12 = arith.constant 0 : index
    %c0_13 = arith.constant 0 : index
    %17 = vector.load %arg6[%c0_12, %c0_13] : memref<512x256xbf16, #tpu.memory_space<vmem>>, vector<512x256xbf16>
    %cst_14 = arith.constant dense<0.000000e+00> : vector<8x256xf32>
    %18 = tpu.matmul %16, %17, %cst_14 {dimension_numbers = #tpu.dot_dimension_numbers<[1], [0], [0], [1], [0, 0, 1, 1], [], []>} : vector<8x512xbf16>, vector<512x256xbf16>, vector<8x256xf32> -> vector<8x256xf32>
    %c0_15 = arith.constant 0 : index
    %c0_16 = arith.constant 0 : index
    %19 = vector.load %arg7[%c0_15, %c0_16] : memref<1x256xf32, #tpu.memory_space<vmem>>, vector<1x256xf32>
    %20 = vector.broadcast %19 : vector<1x256xf32> to vector<8x256xf32>
    %21 = arith.addf %18, %20 : vector<8x256xf32>
    %cst_17 = arith.constant 0.000000e+00 : f32
    %22 = vector.broadcast %cst_17 : f32 to vector<8x256xf32>
    %23 = arith.maximumf %21, %22 : vector<8x256xf32>
    %24 = arith.truncf %23 : vector<8x256xf32> to vector<8x256xbf16>
    %c0_18 = arith.constant 0 : index
    %c0_19 = arith.constant 0 : index
    %25 = vector.load %arg8[%c0_18, %c0_19] : memref<256x64xbf16, #tpu.memory_space<vmem>>, vector<256x64xbf16>
    %cst_20 = arith.constant dense<0.000000e+00> : vector<8x64xf32>
    %26 = tpu.matmul %24, %25, %cst_20 {dimension_numbers = #tpu.dot_dimension_numbers<[1], [0], [0], [1], [0, 0, 1, 1], [], []>} : vector<8x256xbf16>, vector<256x64xbf16>, vector<8x64xf32> -> vector<8x64xf32>
    %c0_21 = arith.constant 0 : index
    %c0_22 = arith.constant 0 : index
    %27 = vector.load %arg9[%c0_21, %c0_22] : memref<1x64xf32, #tpu.memory_space<vmem>>, vector<1x64xf32>
    %28 = vector.broadcast %27 : vector<1x64xf32> to vector<8x64xf32>
    %29 = arith.addf %26, %28 : vector<8x64xf32>
    %cst_23 = arith.constant 0.000000e+00 : f32
    %30 = vector.broadcast %cst_23 : f32 to vector<8x64xf32>
    %31 = arith.maximumf %29, %30 : vector<8x64xf32>
    %c0_24 = arith.constant 0 : index
    %c0_25 = arith.constant 0 : index
    %32 = vector.load %arg10[%c0_24, %c0_25] : memref<8x64xf32, #tpu.memory_space<vmem>>, vector<8x64xf32>
    tpu.vector_store %arg10[%c0_24, %c0_25], %31 {strides = array<i32>} : memref<8x64xf32, #tpu.memory_space<vmem>>, vector<8x64xf32>,
    return
  }
  func.func @transform_0(%arg0: i32) -> (i32, i32) {
    %c0_i32 = arith.constant 0 : i32
    %c0_i32_0 = arith.constant 0 : i32
    return %arg0, %c0_i32 : i32, i32
  }
  func.func @transform_1(%arg0: i32) -> (i32, i32) {
    %c0_i32 = arith.constant 0 : i32
    %c0_i32_0 = arith.constant 0 : i32
    %c0_i32_1 = arith.constant 0 : i32
    return %c0_i32, %c0_i32_0 : i32, i32
  }
  func.func @transform_2(%arg0: i32) -> (i32, i32) {
    %c0_i32 = arith.constant 0 : i32
    %c0_i32_0 = arith.constant 0 : i32
    %c0_i32_1 = arith.constant 0 : i32
    return %c0_i32, %c0_i32_0 : i32, i32
  }
  func.func @transform_3(%arg0: i32) -> (i32, i32) {
    %c0_i32 = arith.constant 0 : i32
    %c0_i32_0 = arith.constant 0 : i32
    %c0_i32_1 = arith.constant 0 : i32
    return %c0_i32, %c0_i32_0 : i32, i32
  }
  func.func @transform_4(%arg0: i32) -> (i32, i32) {
    %c0_i32 = arith.constant 0 : i32
    %c0_i32_0 = arith.constant 0 : i32
    %c0_i32_1 = arith.constant 0 : i32
    return %c0_i32, %c0_i32_0 : i32, i32
  }
  func.func @transform_5(%arg0: i32) -> (i32, i32) {
    %c0_i32 = arith.constant 0 : i32
    %c0_i32_0 = arith.constant 0 : i32
    %c0_i32_1 = arith.constant 0 : i32
    return %c0_i32, %c0_i32_0 : i32, i32
  }
  func.func @transform_6(%arg0: i32) -> (i32, i32) {
    %c0_i32 = arith.constant 0 : i32
    %c0_i32_0 = arith.constant 0 : i32
    %c0_i32_1 = arith.constant 0 : i32
    return %c0_i32, %c0_i32_0 : i32, i32
  }
  func.func @transform_7(%arg0: i32) -> (i32, i32) {
    %c0_i32 = arith.constant 0 : i32
    %c0_i32_0 = arith.constant 0 : i32
    %c0_i32_1 = arith.constant 0 : i32
    return %c0_i32, %c0_i32_0 : i32, i32
  }
  func.func @transform_8(%arg0: i32) -> (i32, i32) {
    %c0_i32 = arith.constant 0 : i32
    %c0_i32_0 = arith.constant 0 : i32
    %c0_i32_1 = arith.constant 0 : i32
    return %c0_i32, %c0_i32_0 : i32, i32
  }
  func.func @transform_9(%arg0: i32) -> (i32, i32) {
    %c0_i32 = arith.constant 0 : i32
    %c0_i32_0 = arith.constant 0 : i32
    return %arg0, %c0_i32 : i32, i32
  }
}

</mosaic_0001>

<bundles_post_ra>
// kernel: mlp_forward.1
= control target key start
LH: loop header
LB: loop body
LE: loop exit
PB: predicated region body
PF: predicated region fallthrough
CT: control target
= control target key end

     0   :  { %14 = vsyncpa [#allocation3], 0  ;;  %s2071_s0 = inlined_call_operand.vmem [shape: bf16[8,128], index: 0, kind: input, shape index: {}]   ;;  %s2072_s1 = inlined_call_operand.vmem [shape: bf16[128,256], index: 1, kind: input, shape index: {}]   ;;  %s2073_s2 = inlined_call_operand.vmem [shape: f32[1,256], index: 2, kind: input, shape index: {}]   ;;  %s2074_s3 = inlined_call_operand.hbm [shape: bf16[256,512], index: 3, kind: input, shape index: {}]   ;;  %s2075_s4 = inlined_call_operand.vmem [shape: f32[1,512], index: 4, kind: input, shape index: {}]   ;;  %s2076_s5 = inlined_call_operand.hbm [shape: bf16[512,256], index: 5, kind: input, shape index: {}]   ;;  %s2077_s6 = inlined_call_operand.vmem [shape: f32[1,256], index: 6, kind: input, shape index: {}]   ;;  %s2078_s7 = inlined_call_operand.vmem [shape: bf16[256,64], index: 7, kind: input, shape index: {}]   ;;  %s2079_s8 = inlined_call_operand.vmem [shape: f32[1,64], index: 8, kind: input, shape index: {}]   ;;  %s2080_s9 = inlined_call_operand.hbm [shape: f32[8,64], index: 9, kind: output, shape index: {}]  }
   0x1   :  { %15 = vsyncpa [#allocation6], 0 }
   0x2   :  { %16 = vsyncpa [#allocation4], 0  ;;  %s1877_s30 = smov [#allocation2]  }
   0x3   :  { %s28_s10 = sshll.u32 %s1877_s30, 4  ;;  %s29_s10 = int_to_ptr.vmem [resolvable:$true] %s28_s10 }
   0x4   :  { %s1819_s11 = scalar_lea.vmem %s29_s10, 8192  ;;  %p1824_p1 = scmp.lt.s32.totalorder %s29_s10, %s29_s10 }
   0x5   :  { %p1820_p0 = scmp.ne.s32.totalorder %s29_s10, %s1819_s11  ;;  %p1825_p2 = scmp.lt.s32.totalorder %s1819_s11, %s1819_s11 }
   0x7   :  { %p1826_p3 = por %p1825_p2, %p1824_p1 }
   0x9   :  { %p1827_p4 = pnand %p1826_p3, %p1820_p0 }
   0xb   :  { %1830 = shalt.err (!%p1827_p4)
}
   0xc   :  { %s1878_s12 = smov 256   ;;  %s1879_s13 = smov 16  }
   0xd   :  { %34 = dma.hbm_to_vmem [thread:$0]  %s2074_s3, 8192, %s29_s10, [#allocation3], %s1878_s12, %s1878_s12, %s1879_s13  }
   0xe   :  { %s1880_s16 = smov [#allocation5]  }
   0xf   :  { %s42_s17 = sshll.u32 %s1880_s16, 4  ;;  %s43_s17 = int_to_ptr.vmem [resolvable:$true] %s42_s17 }
  0x10   :  { %s1839_s18 = scalar_lea.vmem %s43_s17, 8192  ;;  %p1844_p6 = scmp.lt.s32.totalorder %s43_s17, %s43_s17 }
  0x11   :  { %p1840_p5 = scmp.ne.s32.totalorder %s43_s17, %s1839_s18  ;;  %p1845_p7 = scmp.lt.s32.totalorder %s1839_s18, %s1839_s18 }
  0x13   :  { %p1846_p8 = por %p1845_p7, %p1844_p6 }
  0x15   :  { %p1847_p9 = pnand %p1846_p8, %p1840_p5 }
  0x17   :  { %1850 = shalt.err (!%p1847_p9)
}
  0x18   :  { %s1881_s19 = smov 128   ;;  %s1882_s20 = smov 8  }
  0x19   :  { %48 = dma.hbm_to_vmem [thread:$0]  %s2076_s5, 8192, %s43_s17, [#allocation6], %s1881_s19, %s1881_s19, %s1882_s20  }
  0x1a   :  { %1871 = dma.done.wait [#allocation3], 8192  }
  0x1b   :  { %1872 = vsyncadd [#allocation3], 4294959104 }
  0x1c   :  { %1873 = dma.done.wait [#allocation6], 8192  }
  0x1d   :  { %1874 = vsyncadd [#allocation6], 4294959104  ;;  %v1883_v0 = vmov 0   ;;  %v1579_v1 = vld [vmem:[%s2072_s1 + $0x74] ss:$8 sps:$4 sm:$0xff]   ;;  %s1884_s18 = smov [#allocation7]  }
  0x1e   :  { %203 = vmatprep.mubr.bf16.mxu0 %v1883_v0  ;;  %v1581_v2 = vld [vmem:[%s2072_s1 + $0x70] ss:$8 sps:$4 sm:$0xff]   ;;  %171 = vmatprep.subr.bf16.mxu0 %v1579_v1  ;;  %v1582_v3 = vld [vmem:[%s2072_s1 + $0x64] ss:$8 sps:$4 sm:$0xff]   ;;  %v1584_v4 = vld [vmem:[%s2072_s1 + $0x60] ss:$8 sps:$4 sm:$0xff]  }
  0x1f   :  { %172 = vmatpush1.bf16.msra.mxu0 %v1581_v2  ;;  %v1585_v5 = vld [vmem:[%s2072_s1 + $0x54] ss:$8 sps:$4 sm:$0xff]   ;;  %v1587_v6 = vld [vmem:[%s2072_s1 + $0x50] ss:$8 sps:$4 sm:$0xff]   ;;  %v1588_v7 = vld [vmem:[%s2072_s1 + $0x44] ss:$8 sps:$4 sm:$0xff]  }
  0x20   :  { %173 = vmatprep.subr.bf16.mxu0 %v1582_v3  ;;  %v1590_v8 = vld [vmem:[%s2072_s1 + $0x40] ss:$8 sps:$4 sm:$0xff]   ;;  %v1603_v9 = vld [vmem:[#allocation2 + $0xe4] ss:$16 sps:$4 sm:$0xff]   ;;  %v1593_v13 = vld [vmem:[%s2072_s1 + $0x30] ss:$8 sps:$4 sm:$0xff]  }
  0x21   :  { %v1591_v10 = vld [vmem:[%s2072_s1 + $0x34] ss:$8 sps:$4 sm:$0xff]   ;;  %622 = vmatprep.subr.bf16.mxu1 %v1603_v9  ;;  %v1608_v11 = vld [vmem:[#allocation2 + $0xe0] ss:$16 sps:$4 sm:$0xff]   ;;  %v1594_v14 = vld [vmem:[%s2072_s1 + $0x24] ss:$8 sps:$4 sm:$0xff]  }
  0x22   :  { %v1609_v12 = vld [vmem:[#allocation2 + $0xc4] ss:$16 sps:$4 sm:$0xff]   ;;  %623 = vmatpush1.bf16.msra.mxu1 %v1608_v11  ;;  %v1614_v15 = vld [vmem:[#allocation2 + $0xc0] ss:$16 sps:$4 sm:$0xff]   ;;  %v1607_v26 = vld [vmem:[#allocation2 + $0xec] ss:$16 sps:$4 sm:$0xff]  }
  0x23   :  { %174 = vmatpush1.bf16.msra.mxu0 %v1584_v4  ;;  %624 = vmatprep.subr.bf16.mxu1 %v1609_v12  ;;  %v1615_v16 = vld [vmem:[#allocation2 + $0xa4] ss:$16 sps:$4 sm:$0xff]   ;;  %v1596_v17 = vld [vmem:[%s2072_s1 + $0x20] ss:$8 sps:$4 sm:$0xff]   ;;  %v1599_v21 = vld [vmem:[%s2072_s1 + $0x10] ss:$8 sps:$4 sm:$0xff]  }
  0x24   :  { %175 = vmatprep.subr.bf16.mxu0 %v1585_v5  ;;  %v1597_v18 = vld [vmem:[%s2072_s1 + $0x14] ss:$8 sps:$4 sm:$0xff]   ;;  %v1620_v19 = vld [vmem:[#allocation2 + $0xa0] ss:$16 sps:$4 sm:$0xff]   ;;  %v1600_v22 = vld [vmem:[%s2072_s1 + $0x4] ss:$8 sps:$4 sm:$0xff]  }
  0x25   :  { %v1621_v20 = vld [vmem:[#allocation2 + $0x84] ss:$16 sps:$4 sm:$0xff]   ;;  %v1626_v23 = vld [vmem:[#allocation2 + $0x80] ss:$16 sps:$4 sm:$0xff]   ;;  %v1605_v30 = vld [vmem:[#allocation2 + $0xe8] ss:$16 sps:$4 sm:$0xff]  }
  0x26   :  { %625 = vmatpush1.bf16.msra.mxu1 %v1614_v15  ;;  %v1627_v24 = vld [vmem:[#allocation2 + $0x64] ss:$16 sps:$4 sm:$0xff]   ;;  %v1602_v25 = vld [vmem:[%s2072_s1] ss:$8 sps:$4 sm:$0xff]   ;;  %v1613_v31 = vld [vmem:[#allocation2 + $0xcc] ss:$16 sps:$4 sm:$0xff]  }
  0x27   :  { %176 = vmatpush1.bf16.msra.mxu0 %v1587_v6  ;;  %626 = vmatprep.subr.bf16.mxu1 %v1615_v16  ;;  %v1632_v27 = vld [vmem:[#allocation2 + $0x60] ss:$16 sps:$4 sm:$0xff]   ;;  %v1633_v28 = vld [vmem:[#allocation2 + $0x44] ss:$16 sps:$4 sm:$0xff]   ;;  %v1611_v34 = vld [vmem:[#allocation2 + $0xc8] ss:$16 sps:$4 sm:$0xff]  }
  0x28   :  { %177 = vmatprep.subr.bf16.mxu0 %v1588_v7  ;;  %v62_v29 = vld [vmem:[%s2071_s0] sm:$0xf]  ;;  %v1639_v33 = vld [vmem:[#allocation2 + $0x24] ss:$16 sps:$4 sm:$0xff]   ;;  %v1619_v35 = vld [vmem:[#allocation2 + $0xac] ss:$16 sps:$4 sm:$0xff]  }
  0x29   :  { %v1638_v32 = vld [vmem:[#allocation2 + $0x40] ss:$16 sps:$4 sm:$0xff]   ;;  %v1645_v37 = vld [vmem:[#allocation2 + $0x4] ss:$16 sps:$4 sm:$0xff]   ;;  %v1617_v38 = vld [vmem:[#allocation2 + $0xa8] ss:$16 sps:$4 sm:$0xff]  }
  0x2a   :  { %627 = vmatpush1.bf16.msra.mxu1 %v1620_v19  ;;  %v1644_v36 = vld [vmem:[#allocation2 + $0x20] ss:$16 sps:$4 sm:$0xff]   ;;  %v1625_v39 = vld [vmem:[#allocation2 + $0x8c] ss:$16 sps:$4 sm:$0xff]   ;;  %v1651_v41 = vld [vmem:[#allocation2 + $0x1e4] ss:$16 sps:$4 sm:$0xff]  }
  0x2b   :  { %178 = vmatpush1.bf16.msra.mxu0 %v1590_v8  ;;  %628 = vmatprep.subr.bf16.mxu1 %v1621_v20  ;;  %v1650_v40 = vld [vmem:[#allocation2] ss:$16 sps:$4 sm:$0xff]   ;;  %v1623_v42 = vld [vmem:[#allocation2 + $0x88] ss:$16 sps:$4 sm:$0xff]   ;;  %v1631_v43 = vld [vmem:[#allocation2 + $0x6c] ss:$16 sps:$4 sm:$0xff]   ;;  %v81_v20 = vlaneseq }
  0x2c   :  { %179 = vmatprep.subr.bf16.mxu0 %v1591_v10  ;;  %v1656_v44 = vld [vmem:[#allocation2 + $0x1e0] ss:$16 sps:$4 sm:$0xff]   ;;  %v1657_v45 = vld [vmem:[#allocation2 + $0x1c4] ss:$16 sps:$4 sm:$0xff]   ;;  %v1629_v46 = vld [vmem:[#allocation2 + $0x68] ss:$16 sps:$4 sm:$0xff]  }
  0x2d   :  { %v1662_v47 = vld [vmem:[#allocation2 + $0x1c0] ss:$16 sps:$4 sm:$0xff]   ;;  %v1637_v48 = vld [vmem:[#allocation2 + $0x4c] ss:$16 sps:$4 sm:$0xff]   ;;  %v1663_v49 = vld [vmem:[#allocation2 + $0x1a4] ss:$16 sps:$4 sm:$0xff]  }
  0x2e   :  { %629 = vmatpush1.bf16.msra.mxu1 %v1626_v23  ;;  %v1635_v50 = vld [vmem:[#allocation2 + $0x48] ss:$16 sps:$4 sm:$0xff]   ;;  %v1668_v51 = vld [vmem:[#allocation2 + $0x1a0] ss:$16 sps:$4 sm:$0xff]   ;;  %v1643_v52 = vld [vmem:[#allocation2 + $0x2c] ss:$16 sps:$4 sm:$0xff]  }
  0x2f   :  { %180 = vmatpush1.bf16.msra.mxu0 %v1593_v13  ;;  %630 = vmatprep.subr.bf16.mxu1 %v1627_v24  ;;  %v1669_v53 = vld [vmem:[#allocation2 + $0x184] ss:$16 sps:$4 sm:$0xff]   ;;  %v1641_v54 = vld [vmem:[#allocation2 + $0x28] ss:$16 sps:$4 sm:$0xff]   ;;  %v1674_v55 = vld [vmem:[#allocation2 + $0x180] ss:$16 sps:$4 sm:$0xff]  }
  0x30   :  { %181 = vmatprep.subr.bf16.mxu0 %v1594_v14  ;;  %v1649_v56 = vld [vmem:[#allocation2 + $0xc] ss:$16 sps:$4 sm:$0xff]   ;;  %v1675_v57 = vld [vmem:[#allocation2 + $0x164] ss:$16 sps:$4 sm:$0xff]   ;;  %v1647_v58 = vld [vmem:[#allocation2 + $0x8] ss:$16 sps:$4 sm:$0xff]  }
  0x31   :  { %v1680_v59 = vld [vmem:[#allocation2 + $0x160] ss:$16 sps:$4 sm:$0xff]   ;;  %v1655_v60 = vld [vmem:[#allocation2 + $0x1ec] ss:$16 sps:$4 sm:$0xff]   ;;  %v1681_v61 = vld [vmem:[#allocation2 + $0x144] ss:$16 sps:$4 sm:$0xff]  }
  0x32   :  { %631 = vmatpush1.bf16.msra.mxu1 %v1632_v27  ;;  %v1653_v62 = vld [vmem:[#allocation2 + $0x1e8] ss:$16 sps:$4 sm:$0xff]   ;;  %v1686_v63 = vld [vmem:[#allocation2 + $0x140] ss:$16 sps:$4 sm:$0xff]   ;;  %v1661_v0 = vld [vmem:[#allocation2 + $0x1cc] ss:$16 sps:$4 sm:$0xff]  }
  0x33   :  { %182 = vmatpush1.bf16.msra.mxu0 %v1596_v17  ;;  %632 = vmatprep.subr.bf16.mxu1 %v1633_v28  ;;  %v1659_v1 = vld [vmem:[#allocation2 + $0x1c8] ss:$16 sps:$4 sm:$0xff]   ;;  %v1667_v2 = vld [vmem:[#allocation2 + $0x1ac] ss:$16 sps:$4 sm:$0xff]   ;;  %v1687_v10 = vld [vmem:[#allocation2 + $0x124] ss:$16 sps:$4 sm:$0xff]  }
  0x34   :  { %183 = vmatprep.subr.bf16.mxu0 %v1597_v18  ;;  %v1665_v3 = vld [vmem:[#allocation2 + $0x1a8] ss:$16 sps:$4 sm:$0xff]   ;;  %v1673_v4 = vld [vmem:[#allocation2 + $0x18c] ss:$16 sps:$4 sm:$0xff]   ;;  %v1692_v13 = vld [vmem:[#allocation2 + $0x120] ss:$16 sps:$4 sm:$0xff]  }
  0x35   :  { %v1671_v5 = vld [vmem:[#allocation2 + $0x188] ss:$16 sps:$4 sm:$0xff]   ;;  %v1679_v6 = vld [vmem:[#allocation2 + $0x16c] ss:$16 sps:$4 sm:$0xff]   ;;  %v1693_v14 = vld [vmem:[#allocation2 + $0x104] ss:$16 sps:$4 sm:$0xff]  }
  0x36   :  { %633 = vmatpush1.bf16.msra.mxu1 %v1638_v32  ;;  %v1677_v7 = vld [vmem:[#allocation2 + $0x168] ss:$16 sps:$4 sm:$0xff]   ;;  %v1685_v8 = vld [vmem:[#allocation2 + $0x14c] ss:$16 sps:$4 sm:$0xff]   ;;  %v1698_v17 = vld [vmem:[#allocation2 + $0x100] ss:$16 sps:$4 sm:$0xff]  }
  0x37   :  { %184 = vmatpush1.bf16.msra.mxu0 %v1599_v21  ;;  %634 = vmatprep.subr.bf16.mxu1 %v1639_v33  ;;  %v1683_v9 = vld [vmem:[#allocation2 + $0x148] ss:$16 sps:$4 sm:$0xff]   ;;  %v1691_v11 = vld [vmem:[#allocation2 + $0x12c] ss:$16 sps:$4 sm:$0xff]   ;;  %v1992_v21 = vshrl.u32 %v81_v20, 7  ;;  %s1378_s19 = sshll.u32 %s1884_s18, 4  ;;  %s1379_s19 = int_to_ptr.vmem [resolvable:$true] %s1378_s19 }
  0x38   :  { %185 = vmatprep.subr.bf16.mxu0 %v1600_v22  ;;  %v1689_v12 = vld [vmem:[#allocation2 + $0x128] ss:$16 sps:$4 sm:$0xff]   ;;  %v1697_v15 = vld [vmem:[#allocation2 + $0x10c] ss:$16 sps:$4 sm:$0xff]   ;;  %v79_v23 = vld [vmem:[%s2073_s2] sm:$0x3]  ;;  %p1856_p11 = scmp.lt.s32.totalorder %s1379_s19, %s1379_s19 }
  0x39   :  { %v1695_v16 = vld [vmem:[#allocation2 + $0x108] ss:$16 sps:$4 sm:$0xff]   ;;  %v1701_v18 = vld [vmem:[#allocation5 + $0x74] ss:$8 sps:$4 sm:$0xff]   ;;  %v1995_v22 = vsub.s32 0, %v1992_v21  ;;  %v2001_v24 = vsub.s32 1, %v1992_v21 }
  0x3a   :  { %635 = vmatpush1.bf16.msra.mxu1 %v1644_v36  ;;  %v1704_v19 = vld [vmem:[#allocation5 + $0x174] ss:$8 sps:$4 sm:$0xff]   ;;  %v1699_v36 = vld [vmem:[#allocation5 + $0x70] ss:$8 sps:$4 sm:$0xff]   ;;  %vm1370_vm0 = vcmask 523264   ;;  %s1851_s20 = scalar_lea.vmem %s1379_s19, 128 }
  0x3b   :  { %186 = vmatpush1.bf16.msra.mxu0 %v1602_v25  ;;  %636 = vmatprep.subr.bf16.mxu1 %v1645_v37  ;;  %v84_v25 = vrot.slane %v79_v23, %v1995_v22  ;;  %v1702_v37 = vld [vmem:[#allocation5 + $0x170] ss:$8 sps:$4 sm:$0xff]   ;;  %v1776_v20 = vld [vmem:[#allocation5 + $0x1b4] ss:$8 sps:$4 sm:$0xff]   ;;  %p1852_p10 = scmp.ne.s32.totalorder %s1379_s19, %s1851_s20  ;;  %p1857_p12 = scmp.lt.s32.totalorder %s1851_s20, %s1851_s20 }
  0x3c   :  { %663 = vmatprep.subr.bf16.mxu0 %v1607_v26  ;;  %v88_v26 = vrot.slane %v79_v23, %v2001_v24  ;;  %v1771_v23 = vld [vmem:[#allocation5 + $0xb0] ss:$8 sps:$4 sm:$0xff]  }
  0x3d   :  { %p1858_p13 = por %p1857_p12, %p1856_p11 }
  0x3e   :  { %204 = vmatmul.mubr.bf16.vlgmr.msra.gmra.mxu0 %v62_v29  ;;  %637 = vmatpush1.bf16.msra.mxu1 %v1650_v40  ;;  %v1710_v40 = vld [vmem:[#allocation5 + $0x164] ss:$8 sps:$4 sm:$0xff]  }
  0x3f   :  { %664 = vmatpush1.bf16.msra.mxu0 %v1605_v30  ;;  %638 = vmatprep.subr.bf16.mxu1 %v1651_v41  ;;  %v1705_v41 = vld [vmem:[#allocation5 + $0x60] ss:$8 sps:$4 sm:$0xff]   ;;  %p1859_p0 = pnand %p1858_p13, %p1852_p10 }
  0x40   :  { %665 = vmatprep.subr.bf16.mxu0 %v1613_v31 }
  0x42   :  { %639 = vmatpush2.bf16.msra.mxu1 %v1656_v44  ;;  %v1716_v44 = vld [vmem:[#allocation5 + $0x154] ss:$8 sps:$4 sm:$0xff]  }
  0x43   :  { %666 = vmatpush1.bf16.msra.mxu0 %v1611_v34  ;;  %640 = vmatprep.subr.bf16.mxu1 %v1657_v45  ;;  %v1711_v45 = vld [vmem:[#allocation5 + $0x50] ss:$8 sps:$4 sm:$0xff]  }
  0x44   :  { %667 = vmatprep.subr.bf16.mxu0 %v1619_v35 }
  0x46   :  { %641 = vmatpush2.bf16.msra.mxu1 %v1662_v47  ;;  %v1719_v47 = vld [vmem:[#allocation5 + $0x44] ss:$8 sps:$4 sm:$0xff]  }
  0x47   :  { %668 = vmatpush1.bf16.msra.mxu0 %v1617_v38  ;;  %642 = vmatprep.subr.bf16.mxu1 %v1663_v49  ;;  %v1717_v49 = vld [vmem:[#allocation5 + $0x40] ss:$8 sps:$4 sm:$0xff]  }
  0x48   :  { %669 = vmatprep.subr.bf16.mxu0 %v1625_v39  ;;  %v1707_v39 = vld [vmem:[#allocation5 + $0x64] ss:$8 sps:$4 sm:$0xff]  }
  0x4a   :  { %643 = vmatpush2.bf16.msra.mxu1 %v1668_v51  ;;  %v1725_v51 = vld [vmem:[#allocation5 + $0x34] ss:$8 sps:$4 sm:$0xff]  }
  0x4b   :  { %670 = vmatpush1.bf16.msra.mxu0 %v1623_v42  ;;  %644 = vmatprep.subr.bf16.mxu1 %v1669_v53  ;;  %v1708_v42 = vld [vmem:[#allocation5 + $0x160] ss:$8 sps:$4 sm:$0xff]   ;;  %v1723_v53 = vld [vmem:[#allocation5 + $0x30] ss:$8 sps:$4 sm:$0xff]  }
  0x4c   :  { %671 = vmatprep.subr.bf16.mxu0 %v1631_v43  ;;  %v1713_v43 = vld [vmem:[#allocation5 + $0x54] ss:$8 sps:$4 sm:$0xff]  }
  0x4e   :  { %645 = vmatpush2.bf16.msra.mxu1 %v1674_v55  ;;  %v1731_v55 = vld [vmem:[#allocation5 + $0x24] ss:$8 sps:$4 sm:$0xff]  }
  0x4f   :  { %672 = vmatpush1.bf16.msra.mxu0 %v1629_v46  ;;  %646 = vmatprep.subr.bf16.mxu1 %v1675_v57  ;;  %v1714_v46 = vld [vmem:[#allocation5 + $0x150] ss:$8 sps:$4 sm:$0xff]   ;;  %v1729_v57 = vld [vmem:[#allocation5 + $0x20] ss:$8 sps:$4 sm:$0xff]  }
  0x50   :  { %673 = vmatprep.subr.bf16.mxu0 %v1637_v48  ;;  %v1722_v48 = vld [vmem:[#allocation5 + $0x144] ss:$8 sps:$4 sm:$0xff]  }
  0x52   :  { %647 = vmatpush2.bf16.msra.mxu1 %v1680_v59  ;;  %v1737_v59 = vld [vmem:[#allocation5 + $0x14] ss:$8 sps:$4 sm:$0xff]  }
  0x53   :  { %674 = vmatpush1.bf16.msra.mxu0 %v1635_v50  ;;  %648 = vmatprep.subr.bf16.mxu1 %v1681_v61  ;;  %v1720_v50 = vld [vmem:[#allocation5 + $0x140] ss:$8 sps:$4 sm:$0xff]   ;;  %v1735_v61 = vld [vmem:[#allocation5 + $0x10] ss:$8 sps:$4 sm:$0xff]  }
  0x54   :  { %675 = vmatprep.subr.bf16.mxu0 %v1643_v52  ;;  %v1728_v52 = vld [vmem:[#allocation5 + $0x134] ss:$8 sps:$4 sm:$0xff]  }
  0x56   :  { %649 = vmatpush2.bf16.msra.mxu1 %v1686_v63  ;;  %v1743_v63 = vld [vmem:[#allocation5 + $0x4] ss:$8 sps:$4 sm:$0xff]  }
  0x57   :  { %676 = vmatpush1.bf16.msra.mxu0 %v1641_v54  ;;  %650 = vmatprep.subr.bf16.mxu1 %v1687_v10  ;;  %v1726_v54 = vld [vmem:[#allocation5 + $0x130] ss:$8 sps:$4 sm:$0xff]   ;;  %v1756_v10 = vld [vmem:[#allocation5 + $0x1e0] ss:$8 sps:$4 sm:$0xff]  }
  0x58   :  { %677 = vmatprep.subr.bf16.mxu0 %v1649_v56  ;;  %v1734_v56 = vld [vmem:[#allocation5 + $0x124] ss:$8 sps:$4 sm:$0xff]  }
  0x5a   :  { %651 = vmatpush2.bf16.msra.mxu1 %v1692_v13  ;;  %v1759_v13 = vld [vmem:[#allocation5 + $0xd0] ss:$8 sps:$4 sm:$0xff]  }
  0x5b   :  { %678 = vmatpush1.bf16.msra.mxu0 %v1647_v58  ;;  %652 = vmatprep.subr.bf16.mxu1 %v1693_v14  ;;  %v1732_v58 = vld [vmem:[#allocation5 + $0x120] ss:$8 sps:$4 sm:$0xff]   ;;  %v1762_v14 = vld [vmem:[#allocation5 + $0x1d0] ss:$8 sps:$4 sm:$0xff]  }
  0x5c   :  { %679 = vmatprep.subr.bf16.mxu0 %v1655_v60  ;;  %v1740_v60 = vld [vmem:[#allocation5 + $0x114] ss:$8 sps:$4 sm:$0xff]  }
  0x5e   :  { %653 = vmatpush2.bf16.msra.mxu1 %v1698_v17  ;;  %v1765_v17 = vld [vmem:[#allocation5 + $0xc0] ss:$8 sps:$4 sm:$0xff]  }
  0x5f   :  { %680 = vmatpush2.bf16.msra.mxu0 %v1653_v62  ;;  %1108 = vmatprep.subr.bf16.mxu1 %v1701_v18  ;;  %v1738_v62 = vld [vmem:[#allocation5 + $0x110] ss:$8 sps:$4 sm:$0xff]   ;;  %v1768_v18 = vld [vmem:[#allocation5 + $0x1c0] ss:$8 sps:$4 sm:$0xff]  }
  0x60   :  { %681 = vmatprep.subr.bf16.mxu0 %v1661_v0  ;;  %v1746_v0 = vld [vmem:[#allocation5 + $0x104] ss:$8 sps:$4 sm:$0xff]  }
  0x63   :  { %682 = vmatpush2.bf16.msra.mxu0 %v1659_v1  ;;  %v1741_v1 = vld [vmem:[#allocation5] ss:$8 sps:$4 sm:$0xff]  }
  0x64   :  { %683 = vmatprep.subr.bf16.mxu0 %v1667_v2  ;;  %v1744_v2 = vld [vmem:[#allocation5 + $0x100] ss:$8 sps:$4 sm:$0xff]  }
  0x67   :  { %684 = vmatpush2.bf16.msra.mxu0 %v1665_v3  ;;  %v1749_v3 = vld [vmem:[#allocation5 + $0xf4] ss:$8 sps:$4 sm:$0xff]  }
  0x68   :  { %685 = vmatprep.subr.bf16.mxu0 %v1673_v4  ;;  %v1752_v4 = vld [vmem:[#allocation5 + $0x1f4] ss:$8 sps:$4 sm:$0xff]  }
  0x6b   :  { %686 = vmatpush2.bf16.msra.mxu0 %v1671_v5  ;;  %v1747_v5 = vld [vmem:[#allocation5 + $0xf0] ss:$8 sps:$4 sm:$0xff]  }
  0x6c   :  { %687 = vmatprep.subr.bf16.mxu0 %v1679_v6  ;;  %v1750_v6 = vld [vmem:[#allocation5 + $0x1f0] ss:$8 sps:$4 sm:$0xff]  }
  0x6f   :  { %688 = vmatpush2.bf16.msra.mxu0 %v1677_v7  ;;  %v1755_v7 = vld [vmem:[#allocation5 + $0xe4] ss:$8 sps:$4 sm:$0xff]  }
  0x70   :  { %689 = vmatprep.subr.bf16.mxu0 %v1685_v8  ;;  %v1758_v8 = vld [vmem:[#allocation5 + $0x1e4] ss:$8 sps:$4 sm:$0xff]  }
  0x73   :  { %690 = vmatpush2.bf16.msra.mxu0 %v1683_v9  ;;  %v1753_v9 = vld [vmem:[#allocation5 + $0xe0] ss:$8 sps:$4 sm:$0xff]  }
  0x74   :  { %691 = vmatprep.subr.bf16.mxu0 %v1691_v11  ;;  %v1761_v11 = vld [vmem:[#allocation5 + $0xd4] ss:$8 sps:$4 sm:$0xff]  }
  0x77   :  { %692 = vmatpush2.bf16.msra.mxu0 %v1689_v12  ;;  %v1764_v12 = vld [vmem:[#allocation5 + $0x1d4] ss:$8 sps:$4 sm:$0xff]  }
  0x78   :  { %693 = vmatprep.subr.bf16.mxu0 %v1697_v15  ;;  %v1767_v15 = vld [vmem:[#allocation5 + $0xc4] ss:$8 sps:$4 sm:$0xff]  }
  0x7b   :  { %694 = vmatpush2.bf16.msra.mxu0 %v1695_v16  ;;  %v1770_v16 = vld [vmem:[#allocation5 + $0x1c4] ss:$8 sps:$4 sm:$0xff]  }
  0x7c   :  { %1149 = vmatprep.subr.bf16.mxu0 %v1704_v19  ;;  %v1773_v19 = vld [vmem:[#allocation5 + $0xb4] ss:$8 sps:$4 sm:$0xff]  }
  0xfe   :  { %v205_v27 = vpop.f32.mrf.mxu0 }
  0xff   :  { %v206_v28 = vadd.f32 %v205_v27, %v84_v25  ;;  %v1774_v25 = vld [vmem:[#allocation5 + $0x1b0] ss:$8 sps:$4 sm:$0xff]   ;;  %v1782_v27 = vld [vmem:[#allocation5 + $0x1a4] ss:$8 sps:$4 sm:$0xff]  }
 0x100   :  { %v207_v29 = vpop.f32.mrf.mxu0 }
 0x101   :  { %v208_v30 = vadd.f32 %v207_v29, %v88_v26  ;;  %v212_v31 = vmax.f32 %v206_v28, 0.0  ;;  %v1779_v26 = vld [vmem:[#allocation5 + $0xa4] ss:$8 sps:$4 sm:$0xff]   ;;  %v1777_v28 = vld [vmem:[#allocation5 + $0xa0] ss:$8 sps:$4 sm:$0xff]  }
 0x102   :  { %v209_v32 = vpop.f32.mrf.mxu0  ;;  %v1780_v29 = vld [vmem:[#allocation5 + $0x1a0] ss:$8 sps:$4 sm:$0xff]  }
 0x103   :  { %v213_v33 = vmax.f32 %v208_v30, 0.0  ;;  %v214_v38 = vpack.c.bf16 %v212_v31, %v212_v31  ;;  %v1785_v30 = vld [vmem:[#allocation5 + $0x94] ss:$8 sps:$4 sm:$0xff]   ;;  %v1783_v32 = vld [vmem:[#allocation5 + $0x90] ss:$8 sps:$4 sm:$0xff]  }
 0x104   :  { %v210_v34 = vpop.f32.mrf.mxu0  ;;  %v1788_v31 = vld [vmem:[#allocation5 + $0x194] ss:$8 sps:$4 sm:$0xff]  }
 0x105   :  { %v215_v35 = vpack.c.bf16 %v213_v33, %v213_v33  ;;  %v1786_v33 = vld [vmem:[#allocation5 + $0x190] ss:$8 sps:$4 sm:$0xff]   ;;  %v1791_v34 = vld [vmem:[#allocation5 + $0x84] ss:$8 sps:$4 sm:$0xff]  }
 0x107   :  { %654 = vmatprep.mubr.bf16.mxu1 %v215_v35  ;;  %695 = vmatprep.mubr.bf16.mxu0 %v215_v35  ;;  %v1794_v35 = vld [vmem:[#allocation5 + $0x184] ss:$8 sps:$4 sm:$0xff]  }
 0x108   :  { %655 = vmatmul.mubr.bf16.vlgmr.msra.gmra.mxu1 %v214_v38  ;;  %696 = vmatmul.mubr.bf16.vlgmr.msra.gmra.mxu0 %v214_v38  ;;  %v1795_v38 = vld [vmem:[%s2078_s7 + $0x78] sm:$0xff]  }
 0x109   :  { %1109 = vmatpush1.bf16.msra.mxu1 %v1699_v36  ;;  %1150 = vmatpush1.bf16.msra.mxu0 %v1702_v37  ;;  %v1789_v36 = vld [vmem:[#allocation5 + $0x80] ss:$8 sps:$4 sm:$0xff]  }
 0x10a   :  { %1110 = vmatprep.subr.bf16.mxu1 %v1707_v39  ;;  %1151 = vmatprep.subr.bf16.mxu0 %v1710_v40  ;;  %v1792_v37 = vld [vmem:[#allocation5 + $0x180] ss:$8 sps:$4 sm:$0xff]   ;;  %v292_v39 = vsub.s32 2, %v1992_v21 }
 0x10b   :  { %v280_v40 = vld [vmem:[%s2075_s4] sm:$0xf] }
 0x10d   :  { %1111 = vmatpush1.bf16.msra.mxu1 %v1705_v41  ;;  %1152 = vmatpush1.bf16.msra.mxu0 %v1708_v42  ;;  %v296_v41 = vsub.s32 3, %v1992_v21  ;;  %v285_v42 = vrot.slane %v280_v40, %v1995_v22 }
 0x10e   :  { %1112 = vmatprep.subr.bf16.mxu1 %v1713_v43  ;;  %1153 = vmatprep.subr.bf16.mxu0 %v1716_v44  ;;  %v293_v43 = vrot.slane %v280_v40, %v292_v39  ;;  %v289_v44 = vrot.slane %v280_v40, %v2001_v24 }
 0x111   :  { %1113 = vmatpush1.bf16.msra.mxu1 %v1711_v45  ;;  %1154 = vmatpush1.bf16.msra.mxu0 %v1714_v46  ;;  %v297_v45 = vrot.slane %v280_v40, %v296_v41 }
 0x112   :  { %1114 = vmatprep.subr.bf16.mxu1 %v1719_v47  ;;  %1155 = vmatprep.subr.bf16.mxu0 %v1722_v48 }
 0x115   :  { %1115 = vmatpush1.bf16.msra.mxu1 %v1717_v49  ;;  %1156 = vmatpush1.bf16.msra.mxu0 %v1720_v50 }
 0x116   :  { %1116 = vmatprep.subr.bf16.mxu1 %v1725_v51  ;;  %1157 = vmatprep.subr.bf16.mxu0 %v1728_v52 }
 0x119   :  { %1117 = vmatpush1.bf16.msra.mxu1 %v1723_v53  ;;  %1158 = vmatpush1.bf16.msra.mxu0 %v1726_v54 }
 0x11a   :  { %1118 = vmatprep.subr.bf16.mxu1 %v1731_v55  ;;  %1159 = vmatprep.subr.bf16.mxu0 %v1734_v56 }
 0x11d   :  { %1119 = vmatpush1.bf16.msra.mxu1 %v1729_v57  ;;  %1160 = vmatpush1.bf16.msra.mxu0 %v1732_v58 }
 0x11e   :  { %1120 = vmatprep.subr.bf16.mxu1 %v1737_v59  ;;  %1161 = vmatprep.subr.bf16.mxu0 %v1740_v60 }
 0x121   :  { %1121 = vmatpush1.bf16.msra.mxu1 %v1735_v61  ;;  %1162 = vmatpush1.bf16.msra.mxu0 %v1738_v62 }
 0x122   :  { %1122 = vmatprep.subr.bf16.mxu1 %v1743_v63  ;;  %1163 = vmatprep.subr.bf16.mxu0 %v1746_v0  ;;  %v1796_v63 = vld [vmem:[%s2078_s7 + $0x38] sm:$0xff]  }
 0x125   :  { %1123 = vmatpush1.bf16.msra.mxu1 %v1741_v1  ;;  %1164 = vmatpush1.bf16.msra.mxu0 %v1744_v2  ;;  %v1797_v2 = vld [vmem:[%s2078_s7 + $0x70] sm:$0xff]  }
 0x126   :  { %1124 = vmatprep.subr.bf16.mxu1 %v1749_v3  ;;  %1165 = vmatprep.subr.bf16.mxu0 %v1752_v4  ;;  %v1798_v3 = vld [vmem:[%s2078_s7 + $0x30] sm:$0xff]   ;;  %v1799_v4 = vld [vmem:[%s2078_s7 + $0x68] sm:$0xff]  }
 0x129   :  { %1125 = vmatpush2.bf16.msra.mxu1 %v1747_v5  ;;  %1166 = vmatpush2.bf16.msra.mxu0 %v1750_v6  ;;  %v1800_v5 = vld [vmem:[%s2078_s7 + $0x28] sm:$0xff]   ;;  %v1801_v6 = vld [vmem:[%s2078_s7 + $0x60] sm:$0xff]  }
 0x12a   :  { %1126 = vmatprep.subr.bf16.mxu1 %v1755_v7  ;;  %1167 = vmatprep.subr.bf16.mxu0 %v1758_v8  ;;  %v1802_v7 = vld [vmem:[%s2078_s7 + $0x20] sm:$0xff]   ;;  %v1803_v8 = vld [vmem:[%s2078_s7 + $0x58] sm:$0xff]  }
 0x12d   :  { %1127 = vmatpush2.bf16.msra.mxu1 %v1753_v9  ;;  %1168 = vmatpush2.bf16.msra.mxu0 %v1756_v10  ;;  %v1804_v9 = vld [vmem:[%s2078_s7 + $0x18] sm:$0xff]   ;;  %v1805_v10 = vld [vmem:[%s2078_s7 + $0x50] sm:$0xff]  }
 0x12e   :  { %1128 = vmatprep.subr.bf16.mxu1 %v1761_v11  ;;  %1169 = vmatprep.subr.bf16.mxu0 %v1764_v12  ;;  %v1806_v11 = vld [vmem:[%s2078_s7 + $0x10] sm:$0xff]   ;;  %v1807_v12 = vld [vmem:[%s2078_s7 + $0x48] sm:$0xff]  }
 0x131   :  { %1129 = vmatpush2.bf16.msra.mxu1 %v1759_v13  ;;  %1170 = vmatpush2.bf16.msra.mxu0 %v1762_v14  ;;  %v1808_v13 = vld [vmem:[%s2078_s7 + $0x8] sm:$0xff]   ;;  %v1809_v14 = vld [vmem:[%s2078_s7 + $0x40] sm:$0xff]  }
 0x132   :  { %1130 = vmatprep.subr.bf16.mxu1 %v1767_v15  ;;  %1171 = vmatprep.subr.bf16.mxu0 %v1770_v16  ;;  %v1810_v15 = vld [vmem:[%s2078_s7] sm:$0xff]  }
 0x133   :  { %v776_v16 = vld [vmem:[%s2077_s6] sm:$0x3] }
 0x135   :  { %1131 = vmatpush2.bf16.msra.mxu1 %v1765_v17  ;;  %1172 = vmatpush2.bf16.msra.mxu0 %v1768_v18  ;;  %v781_v17 = vrot.slane %v776_v16, %v1995_v22  ;;  %v785_v18 = vrot.slane %v776_v16, %v2001_v24  ;;  %v1532_v24 = vld [vmem:[%s2079_s8] ss:$0 sm:$0xff] }
 0x136   :  { %1132 = vmatprep.subr.bf16.mxu1 %v1773_v19  ;;  %1173 = vmatprep.subr.bf16.mxu0 %v1776_v20 }
 0x139   :  { %1133 = vmatpush2.bf16.msra.mxu1 %v1771_v23  ;;  %1174 = vmatpush2.bf16.msra.mxu0 %v1774_v25 }
 0x13a   :  { %1134 = vmatprep.subr.bf16.mxu1 %v1779_v26  ;;  %1175 = vmatprep.subr.bf16.mxu0 %v1782_v27 }
 0x13d   :  { %1135 = vmatpush2.bf16.msra.mxu1 %v1777_v28  ;;  %1176 = vmatpush2.bf16.msra.mxu0 %v1780_v29 }
 0x13e   :  { %1136 = vmatprep.subr.bf16.mxu1 %v1785_v30  ;;  %1177 = vmatprep.subr.bf16.mxu0 %v1788_v31 }
 0x141   :  { %1137 = vmatpush2.bf16.msra.mxu1 %v1783_v32  ;;  %1178 = vmatpush2.bf16.msra.mxu0 %v1786_v33 }
 0x142   :  { %1138 = vmatprep.subr.bf16.mxu1 %v1791_v34  ;;  %1179 = vmatprep.subr.bf16.mxu0 %v1794_v35 }
 0x145   :  { %1139 = vmatpush2.bf16.msra.mxu1 %v1789_v36  ;;  %1180 = vmatpush2.bf16.msra.mxu0 %v1792_v37 }
 0x146   :  { %1549 = vmatprep.subr.bf16.mxu1 %v1795_v38 }
 0x1c8   :  { %v656_v46 = vpop.f32.mrf.mxu1  ;;  %v697_v47 = vpop.f32.mrf.mxu0 }
 0x1c9   :  { %v657_v48 = vadd.f32 %v656_v46, %v285_v42  ;;  %v698_v49 = vadd.f32 %v697_v47, %v293_v43 }
 0x1ca   :  { %v658_v50 = vpop.f32.mrf.mxu1  ;;  %v699_v51 = vpop.f32.mrf.mxu0 }
 0x1cb   :  { %v659_v52 = vadd.f32 %v658_v50, %v289_v44  ;;  %v700_v53 = vadd.f32 %v699_v51, %v297_v45  ;;  %v704_v54 = vmax.f32 %v657_v48, 0.0  ;;  %v706_v55 = vmax.f32 %v698_v49, 0.0 }
 0x1cc   :  { %v660_v56 = vpop.f32.mrf.mxu1  ;;  %v701_v57 = vpop.f32.mrf.mxu0 }
 0x1cd   :  { %v705_v58 = vmax.f32 %v659_v52, 0.0  ;;  %v707_v21 = vmax.f32 %v700_v53, 0.0  ;;  %v708_v0 = vpack.c.bf16 %v704_v54, %v704_v54  ;;  %v710_v1 = vpack.c.bf16 %v706_v55, %v706_v55 }
 0x1ce   :  { %v661_v59 = vpop.f32.mrf.mxu1  ;;  %v702_v60 = vpop.f32.mrf.mxu0 }
 0x1cf   :  { %v709_v61 = vpack.c.bf16 %v705_v58, %v705_v58  ;;  %v711_v62 = vpack.c.bf16 %v707_v21, %v707_v21 }
 0x1d1   :  { %1140 = vmatprep.mubr.bf16.mxu1 %v709_v61  ;;  %1181 = vmatprep.mubr.bf16.mxu0 %v711_v62 }
 0x1d2   :  { %1141 = vmatmul.mubr.bf16.vlgmr.msra.gmra.mxu1 %v708_v0  ;;  %1182 = vmatmul.mubr.bf16.vlgmr.msra.gmra.mxu0 %v710_v1 }
 0x1d3   :  { %1550 = vmatpush3.bf16.msra.mxu1 %v1796_v63 }
 0x1d4   :  { %1551 = vmatprep.subr.bf16.mxu1 %v1797_v2 }
 0x1d7   :  { %1552 = vmatpush3.bf16.msra.mxu1 %v1798_v3 }
 0x1d8   :  { %1553 = vmatprep.subr.bf16.mxu1 %v1799_v4 }
 0x1db   :  { %1554 = vmatpush3.bf16.msra.mxu1 %v1800_v5 }
 0x1dc   :  { %1555 = vmatprep.subr.bf16.mxu1 %v1801_v6 }
 0x1df   :  { %1556 = vmatpush3.bf16.msra.mxu1 %v1802_v7 }
 0x1e0   :  { %1557 = vmatprep.subr.bf16.mxu1 %v1803_v8 }
 0x1e3   :  { %1558 = vmatpush3.bf16.msra.mxu1 %v1804_v9 }
 0x1e4   :  { %1559 = vmatprep.subr.bf16.mxu1 %v1805_v10 }
 0x1e7   :  { %1560 = vmatpush3.bf16.msra.mxu1 %v1806_v11 }
 0x1e8   :  { %1561 = vmatprep.subr.bf16.mxu1 %v1807_v12 }
 0x1eb   :  { %1562 = vmatpush3.bf16.msra.mxu1 %v1808_v13 }
 0x1ec   :  { %1563 = vmatprep.subr.bf16.mxu1 %v1809_v14 }
 0x1ef   :  { %1564 = vmatpush3.bf16.msra.mxu1 %v1810_v15 }
 0x292   :  { %v1142_v19 = vpop.f32.mrf.mxu1  ;;  %v1183_v20 = vpop.f32.mrf.mxu0 }
 0x293   :  { %v1143_v23 = vadd.f32 %v1142_v19, %v781_v17 }
 0x294   :  { %v1144_v25 = vpop.f32.mrf.mxu1  ;;  %v1185_v26 = vpop.f32.mrf.mxu0 }
 0x295   :  { %v1184_v27 = vadd.f32 %v1183_v20, %v1143_v23  ;;  %v1145_v28 = vadd.f32 %v1144_v25, %v785_v18 }
 0x296   :  { %v1146_v29 = vpop.f32.mrf.mxu1  ;;  %v1187_v30 = vpop.f32.mrf.mxu0 }
 0x297   :  { %v1186_v31 = vadd.f32 %v1185_v26, %v1145_v28  ;;  %v1190_v32 = vmax.f32 %v1184_v27, 0.0 }
 0x298   :  { %v1147_v33 = vpop.f32.mrf.mxu1  ;;  %v1188_v34 = vpop.f32.mrf.mxu0 }
 0x299   :  { %v1191_v35 = vmax.f32 %v1186_v31, 0.0  ;;  %v1192_v37 = vpack.c.bf16 %v1190_v32, %v1190_v32 }
 0x29b   :  { %v1193_v36 = vpack.c.bf16 %v1191_v35, %v1191_v35 }
 0x29d   :  { %1361 = vmatprep.mubr.bf16.mxu1 %v1193_v36 }
 0x29e   :  { %1362 = vmatmul.mubr.bf16.vlgmr.msra.gmra.mxu1 %v1192_v37 }
 0x35e   :  { %v1565_v22 = vpop.f32.mrf.mxu1 }
 0x360   :  { %v1566_v38 = vpop.f32.mrf.mxu1 }
 0x361   :  { %v1567_v39 = vadd.f32 %v1566_v38, %v1565_v22 }
 0x362   :  { %v1568_v40 = vpop.f32.mrf.mxu1 }
 0x363   :  { %v1364_v41 = vadd.f32 %v1567_v39, %v1532_v24 }
 0x364   :  { %v1569_v42 = vpop.f32.mrf.mxu1 }
 0x365   :  { %v1369_v43 = vmax.f32 %v1364_v41, 0.0 }
 0x367   :  { %1371 = vst.msk [vmem:[#allocation7] sm:$0xff] %vm1370_vm0, %v1369_v43 }
 0x368   :  { %1862 = shalt.err (!%p1859_p0)
}
 0x369   :  { %1381 = dma.vmem_to_hbm [thread:$0]  %s1379_s19, 128, %s2080_s9, [#allocation4]  }
 0x36a   :  { %1875 = dma.done.wait [#allocation4], 128  }
 0x36b   :  { %1876 = vsyncadd [#allocation4], 4294967168 }
 0x36c   :  { %1385 = vsyncpa [#allocation3], 1 }
 0x36d   :  { %1386 = vsyncpa [#allocation6], 1 }
 0x36e   :  { %1387 = vsyncpa [#allocation4], 1 }

</bundles_post_ra>
